<compile_context>
chip_gen: v7x
topology: tpu7x:2x2x1
jax: 0.10.0
libtpu: 0.0.40
codegen_flags: <defaults>
</compile_context>

<pallas_src>
import functools

import jax
import jax.numpy as jnp
from jax.experimental import pallas as pl
from jax.experimental.pallas import tpu as pltpu

DIMENSIONALITY = 50
HIDDEN = 150

# Hidden dim padded to a lane-dense multiple of 128 (150 -> 256) so the two
# inner matmuls are fully aligned.  The 50-wide input / output dims are left
# unpadded (Mosaic masks the unaligned contraction / store edges).
H_PAD = 256


def warper_kernel(x_ref, w1_ref, b1_ref, w2_ref, b2_ref, w3_ref, b3_ref, o_ref):
    # x tile: [tile_b, 50] f32 -> bf16 on the VPU (hidden under DMA/MXU slack).
    x = x_ref[...].astype(jnp.bfloat16)

    # Layer 1: Linear(50 -> 256pad) + ReLU  (bf16 x bf16 -> f32 MXU accumulate)
    h1 = jnp.dot(x, w1_ref[...], preferred_element_type=jnp.float32) + b1_ref[...]
    h1 = jnp.maximum(h1, 0.0).astype(jnp.bfloat16)

    # Layer 2: Linear(256pad -> 256pad) + ReLU
    h2 = jnp.dot(h1, w2_ref[...], preferred_element_type=jnp.float32) + b2_ref[...]
    h2 = jnp.maximum(h2, 0.0).astype(jnp.bfloat16)

    # Layer 3: Linear(256pad -> 50), no activation
    out = jnp.dot(h2, w3_ref[...], preferred_element_type=jnp.float32) + b3_ref[...]

    o_ref[...] = out.astype(o_ref.dtype)


def prepare_params(params):
    """One-time prep: cast weights to bf16 and zero-pad the hidden dim to 256.

    Call once and cache the result; do NOT call per forward (the review flagged
    re-padding/re-casting ~180 KB of weights every call as pure wrapper
    overhead).  Padded rows/cols and padded bias entries are zero, so nothing
    leaks into the padded hidden columns.
    Weights are stored as [in, out] (PyTorch weight transposed).
    """
    bf = jnp.bfloat16
    w1 = jnp.pad(params["w1"].astype(bf), ((0, 0), (0, H_PAD - HIDDEN)))       # [50, 256]
    b1 = jnp.pad(params["b1"].astype(jnp.float32), ((0, 0), (0, H_PAD - HIDDEN)))  # [1, 256]
    w2 = jnp.pad(params["w2"].astype(bf),
                 ((0, H_PAD - HIDDEN), (0, H_PAD - HIDDEN)))                   # [256, 256]
    b2 = jnp.pad(params["b2"].astype(jnp.float32), ((0, 0), (0, H_PAD - HIDDEN)))  # [1, 256]
    w3 = jnp.pad(params["w3"].astype(bf), ((0, H_PAD - HIDDEN), (0, 0)))       # [256, 50]
    b3 = params["b3"].astype(jnp.float32)                                      # [1, 50]
    return tuple(jax.device_put(a) for a in (w1, b1, w2, b2, w3, b3))


@functools.partial(jax.jit, static_argnames=("tile_b",))
def warper_forward(x, prepared, tile_b=512):
    """Fused Warper forward.

    x:        [B, 50] float32.
    prepared: tuple from prepare_params() (cached, bf16/padded weights).
    tile_b:   batch rows per grid step.  512 is a good default on every
              generation (>=512 rows amortizes the ~0.35 us/step pipeline
              overhead); 1024-2048 can help slightly on v6e/v7x for very large
              B (sweep).  When tile_b >= 1024 we raise vmem_limit_bytes so
              v5e's 16 MiB scoped-VMEM default is not a constraint.
              For B <= tile_b a single full-extent block is used; for
              B > tile_b the grid has >= 2 tiles so v7x's second TensorCore
              gets work via dimension_semantics=("parallel",).
    """
    B, D = x.shape
    assert D == DIMENSIONALITY
    w1, b1, w2, b2, w3, b3 = prepared

    if B <= tile_b:
        tb = B                                   # single full-extent block (always legal)
    else:
        tb = max(8, (min(tile_b, 2048) // 8) * 8)  # multiple of 8 sublanes
    n_tiles = pl.cdiv(B, tb)                     # masked partial last tile, no batch pad

    cp_kwargs = {}
    if tb >= 1024:
        # Keep well below v7x's 64 MiB physical VMEM; lifts v5e's 16 MiB default.
        cp_kwargs["vmem_limit_bytes"] = 48 * 1024 * 1024

    # Constant index_map -> block index never changes -> weights/biases stay
    # VMEM-resident and are not re-DMA'd after the first grid step.
    const = lambda r, c: pl.BlockSpec((r, c), lambda i: (0, 0))

    out = pl.pallas_call(
        warper_kernel,
        out_shape=jax.ShapeDtypeStruct((B, DIMENSIONALITY), jnp.float32),
        grid=(n_tiles,),
        in_specs=[
            pl.BlockSpec((tb, DIMENSIONALITY), lambda i: (i, 0)),  # x batch tile (f32, unpadded)
            const(DIMENSIONALITY, H_PAD),                          # w1 [50, 256]
            const(1, H_PAD),                                       # b1
            const(H_PAD, H_PAD),                                   # w2 [256, 256]
            const(1, H_PAD),                                       # b2
            const(H_PAD, DIMENSIONALITY),                          # w3 [256, 50]
            const(1, DIMENSIONALITY),                              # b3
        ],
        out_specs=pl.BlockSpec((tb, DIMENSIONALITY), lambda i: (i, 0)),
        compiler_params=pltpu.CompilerParams(
            dimension_semantics=("parallel",), **cp_kwargs),       # megacore on v7x
    )(x, w1, b1, w2, b2, w3, b3)

    return out


def init_params(key):
    """Deterministic init mimicking nn.Linear's uniform(-1/sqrt(fan_in), 1/sqrt(fan_in))."""
    ks = jax.random.split(key, 6)

    def linear(kw, kb, fan_in, fan_out):
        bound = 1.0 / jnp.sqrt(jnp.float32(fan_in))
        # Stored as [in, out] (i.e. PyTorch weight transposed).
        w = jax.random.uniform(kw, (fan_in, fan_out), jnp.float32, -bound, bound)
        b = jax.random.uniform(kb, (1, fan_out), jnp.float32, -bound, bound)
        return w, b

    w1, b1 = linear(ks[0], ks[1], DIMENSIONALITY, HIDDEN)
    w2, b2 = linear(ks[2], ks[3], HIDDEN, HIDDEN)
    w3, b3 = linear(ks[4], ks[5], HIDDEN, DIMENSIONALITY)
    return {"w1": w1, "b1": b1, "w2": w2, "b2": b2, "w3": w3, "b3": b3}


def warper_reference(x, params):
    """Pure-JAX reference using the same bf16-matmul / f32-accumulate numerics."""
    bf = jnp.bfloat16
    h1 = jnp.dot(x.astype(bf), params["w1"].astype(bf),
                 preferred_element_type=jnp.float32) + params["b1"]
    h1 = jnp.maximum(h1, 0.0).astype(bf)
    h2 = jnp.dot(h1, params["w2"].astype(bf),
                 preferred_element_type=jnp.float32) + params["b2"]
    h2 = jnp.maximum(h2, 0.0).astype(bf)
    return jnp.dot(h2, params["w3"].astype(bf),
                   preferred_element_type=jnp.float32) + params["b3"]


if __name__ == "__main__":
    key = jax.random.PRNGKey(0)
    k_params, k_x = jax.random.split(key)

    params = init_params(k_params)
    prepared = prepare_params(params)      # one-time weight prep (cached)

    # batch=8: single full-extent block.  batch=520: 2 grid tiles at the
    # default tile_b=512, exercising the megacore-parallel path and the
    # masked partial last tile.
    for batch in (8, 520):
        kx = jax.random.fold_in(k_x, batch)
        x = jax.random.normal(kx, (batch, DIMENSIONALITY), jnp.float32)

        out = warper_forward(x, prepared)
        jax.block_until_ready(out)

        ref = warper_reference(x, params)
        assert out.shape == (batch, DIMENSIONALITY)
        max_err = float(jnp.max(jnp.abs(out - ref)))
        assert jnp.allclose(out, ref, atol=2e-2, rtol=2e-2), max_err

    print("KERNEL_OK")
</pallas_src>

<mosaic_0001>
module attributes {stable_mosaic.version = 11 : i64} {
  func.func @warper_kernel(%arg0: i32, %arg1: memref<8x50xf32, #tpu.memory_space<vmem>>, %arg2: memref<50x256xbf16, #tpu.memory_space<vmem>>, %arg3: memref<1x256xf32, #tpu.memory_space<vmem>>, %arg4: memref<256x256xbf16, #tpu.memory_space<vmem>>, %arg5: memref<1x256xf32, #tpu.memory_space<vmem>>, %arg6: memref<256x50xbf16, #tpu.memory_space<vmem>>, %arg7: memref<1x50xf32, #tpu.memory_space<vmem>>, %arg8: memref<8x50xf32, #tpu.memory_space<vmem>>) attributes {dimension_semantics = [#tpu.dimension_semantics<parallel>], iteration_bounds = array<i64: 1>, scalar_prefetch = 0 : i64, scratch_operands = 0 : i64, tpu.core_type = #tpu.core_type<tc>, window_params = [{transform_indices = @transform_0, window_bounds = array<i64: 8, 50>}, {pipeline_mode = #tpu.pipeline_mode<synchronous>, transform_indices = @transform_1, window_bounds = array<i64: 50, 256>}, {pipeline_mode = #tpu.pipeline_mode<synchronous>, transform_indices = @transform_2, window_bounds = array<i64: 1, 256>}, {pipeline_mode = #tpu.pipeline_mode<synchronous>, transform_indices = @transform_3, window_bounds = array<i64: 256, 256>}, {pipeline_mode = #tpu.pipeline_mode<synchronous>, transform_indices = @transform_4, window_bounds = array<i64: 1, 256>}, {pipeline_mode = #tpu.pipeline_mode<synchronous>, transform_indices = @transform_5, window_bounds = array<i64: 256, 50>}, {pipeline_mode = #tpu.pipeline_mode<synchronous>, transform_indices = @transform_6, window_bounds = array<i64: 1, 50>}, {transform_indices = @transform_7, window_bounds = array<i64: 8, 50>}]} {
    %c0 = arith.constant 0 : index
    %c0_0 = arith.constant 0 : index
    %0 = vector.load %arg1[%c0, %c0_0] : memref<8x50xf32, #tpu.memory_space<vmem>>, vector<8x50xf32>
    %1 = arith.truncf %0 : vector<8x50xf32> to vector<8x50xbf16>
    %c0_1 = arith.constant 0 : index
    %c0_2 = arith.constant 0 : index
    %2 = vector.load %arg2[%c0_1, %c0_2] : memref<50x256xbf16, #tpu.memory_space<vmem>>, vector<50x256xbf16>
    %cst = arith.constant dense<0.000000e+00> : vector<8x256xf32>
    %3 = tpu.matmul %1, %2, %cst {dimension_numbers = #tpu.dot_dimension_numbers<[1], [0], [0], [1], [0, 0, 1, 1], [], []>} : vector<8x50xbf16>, vector<50x256xbf16>, vector<8x256xf32> -> vector<8x256xf32>
    %c0_3 = arith.constant 0 : index
    %c0_4 = arith.constant 0 : index
    %4 = vector.load %arg3[%c0_3, %c0_4] : memref<1x256xf32, #tpu.memory_space<vmem>>, vector<1x256xf32>
    %5 = vector.broadcast %4 : vector<1x256xf32> to vector<8x256xf32>
    %6 = arith.addf %3, %5 : vector<8x256xf32>
    %cst_5 = arith.constant 0.000000e+00 : f32
    %7 = vector.broadcast %cst_5 : f32 to vector<8x256xf32>
    %8 = arith.maximumf %6, %7 : vector<8x256xf32>
    %9 = arith.truncf %8 : vector<8x256xf32> to vector<8x256xbf16>
    %c0_6 = arith.constant 0 : index
    %c0_7 = arith.constant 0 : index
    %10 = vector.load %arg4[%c0_6, %c0_7] : memref<256x256xbf16, #tpu.memory_space<vmem>>, vector<256x256xbf16>
    %cst_8 = arith.constant dense<0.000000e+00> : vector<8x256xf32>
    %11 = tpu.matmul %9, %10, %cst_8 {dimension_numbers = #tpu.dot_dimension_numbers<[1], [0], [0], [1], [0, 0, 1, 1], [], []>} : vector<8x256xbf16>, vector<256x256xbf16>, vector<8x256xf32> -> vector<8x256xf32>
    %c0_9 = arith.constant 0 : index
    %c0_10 = arith.constant 0 : index
    %12 = vector.load %arg5[%c0_9, %c0_10] : memref<1x256xf32, #tpu.memory_space<vmem>>, vector<1x256xf32>
    %13 = vector.broadcast %12 : vector<1x256xf32> to vector<8x256xf32>
    %14 = arith.addf %11, %13 : vector<8x256xf32>
    %cst_11 = arith.constant 0.000000e+00 : f32
    %15 = vector.broadcast %cst_11 : f32 to vector<8x256xf32>
    %16 = arith.maximumf %14, %15 : vector<8x256xf32>
    %17 = arith.truncf %16 : vector<8x256xf32> to vector<8x256xbf16>
    %c0_12 = arith.constant 0 : index
    %c0_13 = arith.constant 0 : index
    %18 = vector.load %arg6[%c0_12, %c0_13] : memref<256x50xbf16, #tpu.memory_space<vmem>>, vector<256x50xbf16>
    %cst_14 = arith.constant dense<0.000000e+00> : vector<8x50xf32>
    %19 = tpu.matmul %17, %18, %cst_14 {dimension_numbers = #tpu.dot_dimension_numbers<[1], [0], [0], [1], [0, 0, 1, 1], [], []>} : vector<8x256xbf16>, vector<256x50xbf16>, vector<8x50xf32> -> vector<8x50xf32>
    %c0_15 = arith.constant 0 : index
    %c0_16 = arith.constant 0 : index
    %20 = vector.load %arg7[%c0_15, %c0_16] : memref<1x50xf32, #tpu.memory_space<vmem>>, vector<1x50xf32>
    %21 = vector.broadcast %20 : vector<1x50xf32> to vector<8x50xf32>
    %22 = arith.addf %19, %21 : vector<8x50xf32>
    %c0_17 = arith.constant 0 : index
    %c0_18 = arith.constant 0 : index
    %23 = vector.load %arg8[%c0_17, %c0_18] : memref<8x50xf32, #tpu.memory_space<vmem>>, vector<8x50xf32>
    tpu.vector_store %arg8[%c0_17, %c0_18], %22 {strides = array<i32>} : memref<8x50xf32, #tpu.memory_space<vmem>>, vector<8x50xf32>,
    return
  }
  func.func @transform_0(%arg0: i32) -> (i32, i32) {
    %c0_i32 = arith.constant 0 : i32
    %c0_i32_0 = arith.constant 0 : i32
    return %arg0, %c0_i32 : i32, i32
  }
  func.func @transform_1(%arg0: i32) -> (i32, i32) {
    %c0_i32 = arith.constant 0 : i32
    %c0_i32_0 = arith.constant 0 : i32
    %c0_i32_1 = arith.constant 0 : i32
    return %c0_i32, %c0_i32_0 : i32, i32
  }
  func.func @transform_2(%arg0: i32) -> (i32, i32) {
    %c0_i32 = arith.constant 0 : i32
    %c0_i32_0 = arith.constant 0 : i32
    %c0_i32_1 = arith.constant 0 : i32
    return %c0_i32, %c0_i32_0 : i32, i32
  }
  func.func @transform_3(%arg0: i32) -> (i32, i32) {
    %c0_i32 = arith.constant 0 : i32
    %c0_i32_0 = arith.constant 0 : i32
    %c0_i32_1 = arith.constant 0 : i32
    return %c0_i32, %c0_i32_0 : i32, i32
  }
  func.func @transform_4(%arg0: i32) -> (i32, i32) {
    %c0_i32 = arith.constant 0 : i32
    %c0_i32_0 = arith.constant 0 : i32
    %c0_i32_1 = arith.constant 0 : i32
    return %c0_i32, %c0_i32_0 : i32, i32
  }
  func.func @transform_5(%arg0: i32) -> (i32, i32) {
    %c0_i32 = arith.constant 0 : i32
    %c0_i32_0 = arith.constant 0 : i32
    %c0_i32_1 = arith.constant 0 : i32
    return %c0_i32, %c0_i32_0 : i32, i32
  }
  func.func @transform_6(%arg0: i32) -> (i32, i32) {
    %c0_i32 = arith.constant 0 : i32
    %c0_i32_0 = arith.constant 0 : i32
    %c0_i32_1 = arith.constant 0 : i32
    return %c0_i32, %c0_i32_0 : i32, i32
  }
  func.func @transform_7(%arg0: i32) -> (i32, i32) {
    %c0_i32 = arith.constant 0 : i32
    %c0_i32_0 = arith.constant 0 : i32
    return %arg0, %c0_i32 : i32, i32
  }
}

</mosaic_0001>

<bundles_post_ra>
// kernel: warper_forward.1
= control target key start
LH: loop header
LB: loop body
LE: loop exit
PB: predicated region body
PF: predicated region fallthrough
CT: control target
= control target key end

     0   :  { %12 = vsyncpa [#allocation3], 0  ;;  %s955_s0 = inlined_call_operand.vmem [shape: f32[8,50], index: 0, kind: input, shape index: {}]   ;;  %s956_s1 = inlined_call_operand.vmem [shape: bf16[50,256], index: 1, kind: input, shape index: {}]   ;;  %s957_s2 = inlined_call_operand.vmem [shape: f32[1,256], index: 2, kind: input, shape index: {}]   ;;  %s958_s3 = inlined_call_operand.hbm [shape: bf16[256,256], index: 3, kind: input, shape index: {}]   ;;  %s959_s4 = inlined_call_operand.vmem [shape: f32[1,256], index: 4, kind: input, shape index: {}]   ;;  %s960_s5 = inlined_call_operand.vmem [shape: bf16[256,50], index: 5, kind: input, shape index: {}]   ;;  %s961_s6 = inlined_call_operand.vmem [shape: f32[1,50], index: 6, kind: input, shape index: {}]   ;;  %s962_s7 = inlined_call_operand.hbm [shape: f32[8,50], index: 7, kind: output, shape index: {}]  }
   0x1   :  { %13 = vsyncpa [#allocation4], 0  ;;  %s803_s24 = smov [#allocation2]   ;;  %s755_s28 = scalar_lea.hbm %s958_s3, 4096 }
   0x2   :  { %s25_s25 = sshll.u32 %s803_s24, 4  ;;  %p756_p0 = scmp.ne.s32.totalorder %s958_s3, %s755_s28  ;;  %s26_s25 = int_to_ptr.vmem [resolvable:$true] %s25_s25 }
   0x3   :  { %p759_p1 = scmp.lt.u32.totalorder %s755_s28, %s958_s3 }
   0x5   :  { %p761_p2 = pnand %p759_p1, %p756_p0 }
   0x7   :  { %764 = shalt.err (!%p761_p2)
}
   0x8   :  { %s765_s10 = scalar_lea.vmem %s26_s25, 4096  ;;  %p770_p4 = scmp.lt.s32.totalorder %s26_s25, %s26_s25 }
   0x9   :  { %p766_p3 = scmp.ne.s32.totalorder %s26_s25, %s765_s10  ;;  %p771_p5 = scmp.lt.s32.totalorder %s765_s10, %s765_s10 }
   0xb   :  { %p772_p6 = por %p771_p5, %p770_p4 }
   0xd   :  { %p773_p7 = pnand %p772_p6, %p766_p3 }
   0xf   :  { %776 = shalt.err (!%p773_p7)
}
  0x10   :  { %s804_s11 = smov 128   ;;  %s805_s12 = smov 8  }
  0x11   :  { %31 = dma.hbm_to_vmem [thread:$0]  %s958_s3, 4096, %s26_s25, [#allocation3], %s804_s11, %s804_s11, %s805_s12  }
  0x12   :  { %799 = dma.done.wait [#allocation3], 4096  }
  0x13   :  { %800 = vsyncadd [#allocation3], 4294963200  ;;  %v806_v0 = vmov 0   ;;  %v680_v1 = vld [vmem:[%s956_s1 + $0x4] ss:$8 sps:$4 sm:$0xff]   ;;  %vm102_vm0 = vcmask 1040384   ;;  %v53_v57 = vlaneseq }
  0x14   :  { %141 = vmatprep.mubr.bf16.mxu0 %v806_v0  ;;  %v682_v2 = vld [vmem:[%s956_s1] ss:$8 sps:$4 sm:$0xff]   ;;  %109 = vmatprep.subr.bf16.mxu0 %v680_v1  ;;  %v683_v3 = vld [vmem:[%s956_s1 + $0x14] ss:$8 sps:$4 sm:$0xff]   ;;  %v685_v4 = vld [vmem:[%s956_s1 + $0x10] ss:$8 sps:$4 sm:$0xff]  }
  0x15   :  { %110 = vmatpush1.bf16.msra.mxu0 %v682_v2  ;;  %v686_v5 = vld [vmem:[%s956_s1 + $0x24] ss:$8 sps:$4 sm:$0xff]   ;;  %v50_v6 = vld [vmem:[%s956_s1 + $0x30] sm:$0x11]  ;;  %v693_v8 = vld [vmem:[#allocation2] ss:$8 sps:$4 sm:$0xff]  }
  0x16   :  { %111 = vmatprep.subr.bf16.mxu0 %v683_v3  ;;  %v691_v7 = vld [vmem:[#allocation2 + $0x4] ss:$8 sps:$4 sm:$0xff]   ;;  %v694_v9 = vld [vmem:[#allocation2 + $0x14] ss:$8 sps:$4 sm:$0xff]   ;;  %v688_v10 = vld [vmem:[%s956_s1 + $0x20] ss:$8 sps:$4 sm:$0xff]   ;;  %v601_v11 = vcombine.high %v50_v6, %v50_v6  ;;  %v600_v12 = vcombine.low %v50_v6, %v50_v6 }
  0x17   :  { %358 = vmatprep.subr.bf16.mxu1 %v691_v7  ;;  %v696_v13 = vld [vmem:[#allocation2 + $0x10] ss:$8 sps:$4 sm:$0xff]   ;;  %v697_v14 = vld [vmem:[#allocation2 + $0x24] ss:$8 sps:$4 sm:$0xff]   ;;  %v699_v17 = vld [vmem:[#allocation2 + $0x20] ss:$8 sps:$4 sm:$0xff]  }
  0x18   :  { %359 = vmatpush1.bf16.msra.mxu1 %v693_v8  ;;  %v42_v15 = vld [vmem:[%s955_s0] sm:$0xff]  ;;  %v104_v16 = vsel %vm102_vm0, %v600_v12, 0  ;;  %v700_v18 = vld [vmem:[#allocation2 + $0x34] ss:$8 sps:$4 sm:$0xff]   ;;  %vm98_vm1 = vcmask 408576   ;;  %v741_v47 = vld [vmem:[%s960_s5 + $0x48] sm:$0xff]  }
  0x19   :  { %112 = vmatpush1.bf16.msra.mxu0 %v685_v4  ;;  %360 = vmatprep.subr.bf16.mxu1 %v694_v9  ;;  %v43_v19 = vpack.c.bf16 %v42_v15, %v42_v15  ;;  %v702_v20 = vld [vmem:[#allocation2 + $0x30] ss:$8 sps:$4 sm:$0xff]   ;;  %v703_v21 = vld [vmem:[#allocation2 + $0x44] ss:$8 sps:$4 sm:$0xff]   ;;  %v705_v22 = vld [vmem:[#allocation2 + $0x40] ss:$8 sps:$4 sm:$0xff]  }
  0x1a   :  { %113 = vmatprep.subr.bf16.mxu0 %v686_v5  ;;  %v706_v23 = vld [vmem:[#allocation2 + $0x54] ss:$8 sps:$4 sm:$0xff]   ;;  %v708_v24 = vld [vmem:[#allocation2 + $0x50] ss:$8 sps:$4 sm:$0xff]   ;;  %v709_v25 = vld [vmem:[#allocation2 + $0x64] ss:$8 sps:$4 sm:$0xff]  }
  0x1b   :  { %v711_v26 = vld [vmem:[#allocation2 + $0x60] ss:$8 sps:$4 sm:$0xff]   ;;  %v712_v27 = vld [vmem:[#allocation2 + $0x74] ss:$8 sps:$4 sm:$0xff]   ;;  %v714_v28 = vld [vmem:[#allocation2 + $0x70] ss:$8 sps:$4 sm:$0xff]  }
  0x1c   :  { %361 = vmatpush1.bf16.msra.mxu1 %v696_v13  ;;  %v715_v29 = vld [vmem:[#allocation2 + $0x84] ss:$8 sps:$4 sm:$0xff]   ;;  %v717_v30 = vld [vmem:[#allocation2 + $0x80] ss:$8 sps:$4 sm:$0xff]   ;;  %v718_v31 = vld [vmem:[#allocation2 + $0x94] ss:$8 sps:$4 sm:$0xff]  }
  0x1d   :  { %114 = vmatpush1.bf16.msra.mxu0 %v688_v10  ;;  %362 = vmatprep.subr.bf16.mxu1 %v697_v14  ;;  %v720_v32 = vld [vmem:[#allocation2 + $0x90] ss:$8 sps:$4 sm:$0xff]   ;;  %v721_v33 = vld [vmem:[#allocation2 + $0xa4] ss:$8 sps:$4 sm:$0xff]   ;;  %v723_v34 = vld [vmem:[#allocation2 + $0xa0] ss:$8 sps:$4 sm:$0xff]  }
  0x1e   :  { %602 = vmatprep.subr.msk.bf16.mxu0 %vm102_vm0, %v601_v11  ;;  %v724_v35 = vld [vmem:[#allocation2 + $0xb4] ss:$8 sps:$4 sm:$0xff]   ;;  %v726_v36 = vld [vmem:[#allocation2 + $0xb0] ss:$8 sps:$4 sm:$0xff]   ;;  %v727_v37 = vld [vmem:[#allocation2 + $0xc4] ss:$8 sps:$4 sm:$0xff]  }
  0x1f   :  { %v729_v38 = vld [vmem:[#allocation2 + $0xc0] ss:$8 sps:$4 sm:$0xff]   ;;  %v730_v39 = vld [vmem:[#allocation2 + $0xd4] ss:$8 sps:$4 sm:$0xff]   ;;  %v732_v40 = vld [vmem:[#allocation2 + $0xd0] ss:$8 sps:$4 sm:$0xff]  }
  0x20   :  { %363 = vmatpush1.bf16.msra.mxu1 %v699_v17  ;;  %v733_v41 = vld [vmem:[#allocation2 + $0xe4] ss:$8 sps:$4 sm:$0xff]   ;;  %v735_v42 = vld [vmem:[#allocation2 + $0xe0] ss:$8 sps:$4 sm:$0xff]   ;;  %v736_v43 = vld [vmem:[#allocation2 + $0xf4] ss:$8 sps:$4 sm:$0xff]  }
  0x21   :  { %116 = vmatpush1.bf16.msra.mxu0 %v104_v16  ;;  %364 = vmatprep.subr.bf16.mxu1 %v700_v18  ;;  %v738_v44 = vld [vmem:[#allocation2 + $0xf0] ss:$8 sps:$4 sm:$0xff]   ;;  %v739_v45 = vld [vmem:[%s960_s5 + $0x40] sm:$0xff]   ;;  %v742_v48 = vld [vmem:[%s960_s5 + $0x8] sm:$0xff]   ;;  %v54_v58 = vshrl.u32 %v53_v57, 7 }
  0x22   :  { %v740_v46 = vld [vmem:[%s960_s5] sm:$0xff]   ;;  %653 = vmatprep.subr.bf16.mxu0 %v739_v45  ;;  %v743_v49 = vld [vmem:[%s960_s5 + $0x50] sm:$0xff]   ;;  %v745_v51 = vld [vmem:[%s960_s5 + $0x58] sm:$0xff]  }
  0x23   :  { %v744_v50 = vld [vmem:[%s960_s5 + $0x10] sm:$0xff]   ;;  %v746_v52 = vld [vmem:[%s960_s5 + $0x18] sm:$0xff]   ;;  %v747_v53 = vld [vmem:[%s960_s5 + $0x60] sm:$0xff]   ;;  %v55_v59 = vsub.s32 0, %v54_v58  ;;  %v59_v61 = vsub.s32 1, %v54_v58 }
  0x24   :  { %603 = vmatmul.mubr.msk.bf16.vlgmr.msra.gmra.mrb[0].mxu0 %vm98_vm1, %v43_v19  ;;  %365 = vmatpush1.bf16.msra.mxu1 %v702_v20  ;;  %v748_v54 = vld [vmem:[%s960_s5 + $0x20] sm:$0xff]   ;;  %v749_v55 = vld [vmem:[%s960_s5 + $0x68] sm:$0xff]   ;;  %v751_v10 = vld [vmem:[%s960_s5 + $0x70] sm:$0xff]  }
  0x25   :  { %366 = vmatprep.subr.bf16.mxu1 %v703_v21  ;;  %654 = vmatpush3.bf16.msra.mxu0 %v740_v46  ;;  %v750_v56 = vld [vmem:[%s960_s5 + $0x28] sm:$0xff]   ;;  %v51_v60 = vld [vmem:[%s957_s2] sm:$0x3]  ;;  %v752_v11 = vld [vmem:[%s960_s5 + $0x30] sm:$0xff]  }
  0x26   :  { %655 = vmatprep.subr.bf16.mxu0 %v741_v47  ;;  %v56_v62 = vrot.slane %v51_v60, %v55_v59  ;;  %v60_v63 = vrot.slane %v51_v60, %v59_v61  ;;  %v753_v12 = vld [vmem:[%s960_s5 + $0x78] sm:$0xff]   ;;  %v186_v14 = vld [vmem:[%s959_s4] sm:$0x3]  ;;  %s807_s4 = smov [#allocation5]  }
  0x27   :  { %v754_v13 = vld [vmem:[%s960_s5 + $0x38] sm:$0xff]   ;;  %v191_v15 = vrot.slane %v186_v14, %v55_v59  ;;  %v195_v16 = vrot.slane %v186_v14, %v59_v61  ;;  %s585_s15 = sshll.u32 %s807_s4, 4  ;;  %s586_s15 = int_to_ptr.vmem [resolvable:$true] %s585_s15 }
  0x28   :  { %367 = vmatpush1.bf16.msra.mxu1 %v705_v22  ;;  %s777_s16 = scalar_lea.vmem %s586_s15, 128  ;;  %p782_p9 = scmp.lt.s32.totalorder %s586_s15, %s586_s15 }
  0x29   :  { %368 = vmatprep.subr.bf16.mxu1 %v706_v23  ;;  %656 = vmatpush3.bf16.msra.mxu0 %v742_v48  ;;  %p778_p8 = scmp.ne.s32.totalorder %s586_s15, %s777_s16  ;;  %p783_p10 = scmp.lt.s32.totalorder %s777_s16, %s777_s16 }
  0x2a   :  { %657 = vmatprep.subr.bf16.mxu0 %v743_v49 }
  0x2b   :  { %p784_p11 = por %p783_p10, %p782_p9 }
  0x2c   :  { %369 = vmatpush1.bf16.msra.mxu1 %v708_v24 }
  0x2d   :  { %370 = vmatprep.subr.bf16.mxu1 %v709_v25  ;;  %658 = vmatpush3.bf16.msra.mxu0 %v744_v50  ;;  %p785_p12 = pnand %p784_p11, %p778_p8 }
  0x2e   :  { %659 = vmatprep.subr.bf16.mxu0 %v745_v51 }
  0x30   :  { %371 = vmatpush1.bf16.msra.mxu1 %v711_v26 }
  0x31   :  { %372 = vmatprep.subr.bf16.mxu1 %v712_v27  ;;  %660 = vmatpush3.bf16.msra.mxu0 %v746_v52 }
  0x32   :  { %661 = vmatprep.subr.bf16.mxu0 %v747_v53 }
  0x34   :  { %373 = vmatpush1.bf16.msra.mxu1 %v714_v28  ;;  %v636_v28 = vld [vmem:[%s961_s6] ss:$0 sm:$0xff] }
  0x35   :  { %374 = vmatprep.subr.bf16.mxu1 %v715_v29  ;;  %662 = vmatpush3.bf16.msra.mxu0 %v748_v54 }
  0x36   :  { %663 = vmatprep.subr.bf16.mxu0 %v749_v55 }
  0x38   :  { %375 = vmatpush1.bf16.msra.mxu1 %v717_v30 }
  0x39   :  { %376 = vmatprep.subr.bf16.mxu1 %v718_v31  ;;  %664 = vmatpush3.bf16.msra.mxu0 %v750_v56 }
  0x3a   :  { %665 = vmatprep.subr.bf16.mxu0 %v751_v10 }
  0x3c   :  { %377 = vmatpush1.bf16.msra.mxu1 %v720_v32 }
  0x3d   :  { %378 = vmatprep.subr.bf16.mxu1 %v721_v33  ;;  %666 = vmatpush3.bf16.msra.mxu0 %v752_v11 }
  0x3e   :  { %667 = vmatprep.subr.bf16.mxu0 %v753_v12 }
  0x40   :  { %379 = vmatpush1.bf16.msra.mxu1 %v723_v34 }
  0x41   :  { %380 = vmatprep.subr.bf16.mxu1 %v724_v35  ;;  %668 = vmatpush3.bf16.msra.mxu0 %v754_v13 }
  0x44   :  { %381 = vmatpush1.bf16.msra.mxu1 %v726_v36 }
  0x45   :  { %382 = vmatprep.subr.bf16.mxu1 %v727_v37 }
  0x48   :  { %383 = vmatpush1.bf16.msra.mxu1 %v729_v38 }
  0x49   :  { %384 = vmatprep.subr.bf16.mxu1 %v730_v39 }
  0x4c   :  { %385 = vmatpush1.bf16.msra.mxu1 %v732_v40 }
  0x4d   :  { %386 = vmatprep.subr.bf16.mxu1 %v733_v41 }
  0x50   :  { %387 = vmatpush1.bf16.msra.mxu1 %v735_v42 }
  0x51   :  { %388 = vmatprep.subr.bf16.mxu1 %v736_v43 }
  0x54   :  { %389 = vmatpush1.bf16.msra.mxu1 %v738_v44 }
  0xf7   :  { %v143_v0 = vpop.f32.mrb[0].mxu0 }
  0xf8   :  { %v144_v1 = vadd.f32 %v143_v0, %v56_v62  ;;  %v145_v2 = vpop.f32.mrb[1].mxu0 }
  0xf9   :  { %v146_v3 = vadd.f32 %v145_v2, %v60_v63  ;;  %v147_v4 = vpop.f32.mrb[2].mxu0 }
  0xfa   :  { %v150_v5 = vmax.f32 %v144_v1, 0.0  ;;  %v148_v6 = vpop.f32.mrb[3].mxu0 }
  0xfb   :  { %v151_v7 = vmax.f32 %v146_v3, 0.0 }
  0xfc   :  { %v152_v9 = vpack.c.bf16 %v150_v5, %v150_v5 }
  0xfd   :  { %v153_v8 = vpack.c.bf16 %v151_v7, %v151_v7 }
  0xff   :  { %390 = vmatprep.mubr.bf16.mxu1 %v153_v8 }
 0x100   :  { %391 = vmatmul.mubr.bf16.vlgmr.msra.gmra.mrb[0].mxu1 %v152_v9 }
 0x1d3   :  { %v392_v17 = vpop.f32.mrb[0].mxu1 }
 0x1d4   :  { %v393_v18 = vadd.f32 %v392_v17, %v191_v15  ;;  %v394_v19 = vpop.f32.mrb[1].mxu1 }
 0x1d5   :  { %v395_v20 = vadd.f32 %v394_v19, %v195_v16  ;;  %v396_v21 = vpop.f32.mrb[2].mxu1 }
 0x1d6   :  { %v399_v22 = vmax.f32 %v393_v18, 0.0  ;;  %v397_v23 = vpop.f32.mrb[3].mxu1 }
 0x1d7   :  { %v400_v24 = vmax.f32 %v395_v20, 0.0 }
 0x1d8   :  { %v401_v26 = vpack.c.bf16 %v399_v22, %v399_v22 }
 0x1d9   :  { %v402_v25 = vpack.c.bf16 %v400_v24, %v400_v24 }
 0x1db   :  { %570 = vmatprep.mubr.bf16.mxu0 %v402_v25 }
 0x1dc   :  { %571 = vmatmul.mubr.bf16.vlgmr.msra.gmra.mrb[4].mxu0 %v401_v26 }
 0x2af   :  { %v669_v27 = vpop.f32.mrb[4].mxu0 }
 0x2b0   :  { %v670_v29 = vpop.f32.mrb[5].mxu0 }
 0x2b1   :  { %v671_v30 = vadd.f32 %v670_v29, %v669_v27  ;;  %v672_v31 = vpop.f32.mrb[6].mxu0 }
 0x2b2   :  { %v673_v32 = vpop.f32.mrb[7].mxu0 }
 0x2b3   :  { %v573_v33 = vadd.f32 %v671_v30, %v636_v28 }
 0x2b5   :  { %578 = vst.msk [vmem:[#allocation5] sm:$0xff] %vm98_vm1, %v573_v33 }
 0x2b6   :  { %788 = shalt.err (!%p785_p12)
}
 0x2b7   :  { %s789_s6 = scalar_lea.hbm %s962_s7, 128 }
 0x2b8   :  { %p790_p13 = scmp.ne.s32.totalorder %s962_s7, %s789_s6  ;;  %p793_p0 = scmp.lt.u32.totalorder %s789_s6, %s962_s7 }
 0x2ba   :  { %p795_p1 = pnand %p793_p0, %p790_p13 }
 0x2bc   :  { %798 = shalt.err (!%p795_p1)
}
 0x2bd   :  { %588 = dma.vmem_to_hbm [thread:$0]  %s586_s15, 128, %s962_s7, [#allocation4]  }
 0x2be   :  { %801 = dma.done.wait [#allocation4], 128  }
 0x2bf   :  { %802 = vsyncadd [#allocation4], 4294967168 }
 0x2c0   :  { %592 = vsyncpa [#allocation3], 1 }
 0x2c1   :  { %593 = vsyncpa [#allocation4], 1 }

</bundles_post_ra>
